<compile_context>
chip_gen: v7x
topology: tpu7x:2x2x1
jax: 0.10.0
libtpu: 0.0.40
codegen_flags: <defaults>
</compile_context>

<pallas_src>
import jax
import jax.numpy as jnp
from jax.experimental import pallas as pl
from jax.experimental.pallas import tpu as pltpu


def _masked_max_kernel(x_ref, m_ref, o_ref):
    # x_ref: (1, TS, TH) activation tile
    # m_ref: (1, TS, 1)  mask tile (same block reused for every h tile)
    # o_ref: (1, 1, TH)  output tile, resident across the S (reduction) grid axis
    s_step = pl.program_id(2)

    x = x_ref[...]
    m = m_ref[...]
    # PyTorch: embeddings[input_mask_expanded == 0] = -10000.0
    masked = jnp.where(m == 0, jnp.full_like(x, -10000.0), x)
    cur = jnp.max(masked, axis=1, keepdims=True)  # (1, 1, TH)

    @pl.when(s_step == 0)
    def _():
        o_ref[...] = cur

    @pl.when(s_step > 0)
    def _():
        o_ref[...] = jnp.maximum(o_ref[...], cur)


def _choose_tile(dim: int, align: int, max_tile: int) -> int:
    """Largest divisor of `dim` that is a multiple of `align` and <= max_tile.

    Falls back to the full dim when no aligned divisor exists (block == full dim
    always satisfies the (8, 128) rule)."""
    if dim <= max_tile or dim % align != 0:
        return dim
    t = (max_tile // align) * align
    while t >= align:
        if dim % t == 0:
            return t
        t -= align
    return dim


def max_pooling(last_hidden_state, attention_mask):
    """Pallas TPU masked max-pooling.

    last_hidden_state: [B, S, H] float (f32 or bf16 — kept in its dtype)
    attention_mask:    [B, S]    (0/1, any numeric dtype)
    returns:           [B, H]    same dtype as last_hidden_state
    """
    B, S, H = last_hidden_state.shape
    x_dtype = last_hidden_state.dtype
    itemsize = jnp.dtype(x_dtype).itemsize

    # Lane-dense H tiles (multiple of 128 when H allows), bounded S reduction tiles.
    TH = _choose_tile(H, 128, 512)
    TS = _choose_tile(S, 8, 1024)
    h_tiles = H // TH
    s_tiles = S // TS

    # Mask kept tiny and in the activation dtype (no separate f32 slab).
    mask3 = attention_mask.reshape(B, S, 1).astype(x_dtype)

    # Explicit scoped-VMEM budget: double-buffered x tile + mask tile + out tile, plus margin.
    per_step = TS * TH * itemsize + TS * itemsize + TH * itemsize
    vmem_limit = max(2 * per_step + (4 << 20), 16 << 20)

    cost = pl.CostEstimate(
        flops=B * S * H,                     # compare/select + max per element
        transcendentals=0,
        bytes_accessed=B * S * H * itemsize  # activations read
        + B * S * itemsize * h_tiles         # (tiny) mask re-read per H tile
        + B * H * itemsize,                  # output write
    )

    out = pl.pallas_call(
        _masked_max_kernel,
        out_shape=jax.ShapeDtypeStruct((B, 1, H), x_dtype),
        grid=(B, h_tiles, s_tiles),
        in_specs=[
            pl.BlockSpec((1, TS, TH), lambda b, h, s: (b, s, h)),
            pl.BlockSpec((1, TS, 1), lambda b, h, s: (b, s, 0)),  # ignores h
        ],
        out_specs=pl.BlockSpec((1, 1, TH), lambda b, h, s: (b, 0, h)),
        compiler_params=pltpu.CompilerParams(
            dimension_semantics=("parallel", "parallel", "arbitrary"),
            vmem_limit_bytes=int(vmem_limit),
        ),
        cost_estimate=cost,
    )(last_hidden_state, mask3)
    return out.reshape(B, H)


def _reference(last_hidden_state, attention_mask):
    m = attention_mask[..., None].astype(last_hidden_state.dtype)
    emb = jnp.where(m == 0, jnp.asarray(-10000.0, last_hidden_state.dtype), last_hidden_state)
    return jnp.max(emb, axis=1)


if __name__ == "__main__":
    key = jax.random.PRNGKey(0)
    k1, k2 = jax.random.split(key)

    B, S, H = 2, 8, 32
    last_hidden_state = jax.random.normal(k1, (B, S, H), dtype=jnp.float32)
    # deterministic 0/1 mask with a few padded positions per row
    attention_mask = (jax.random.uniform(k2, (B, S)) > 0.3).astype(jnp.int32)
    # make sure each row has at least one valid token
    attention_mask = attention_mask.at[:, 0].set(1)

    out = max_pooling(last_hidden_state, attention_mask)
    out = jax.block_until_ready(out)

    ref = _reference(last_hidden_state, attention_mask)
    assert out.shape == (B, H)
    assert jnp.allclose(out, ref, atol=1e-6), "mismatch vs reference"

    print("KERNEL_OK")
</pallas_src>

<mosaic_0001>
module attributes {stable_mosaic.version = 11 : i64} {
  func.func @_masked_max_kernel(%arg0: i32, %arg1: i32, %arg2: i32, %arg3: memref<1x8x32xf32, #tpu.memory_space<vmem>>, %arg4: memref<1x8x1xf32, #tpu.memory_space<vmem>>, %arg5: memref<1x1x32xf32, #tpu.memory_space<vmem>>) attributes {dimension_semantics = [#tpu.dimension_semantics<parallel>, #tpu.dimension_semantics<parallel>, #tpu.dimension_semantics<arbitrary>], iteration_bounds = array<i64: 2, 1, 1>, scalar_prefetch = 0 : i64, scratch_operands = 0 : i64, tpu.core_type = #tpu.core_type<tc>, window_params = [{transform_indices = @transform_0, window_bounds = array<i64: 1, 8, 32>}, {transform_indices = @transform_1, window_bounds = array<i64: 1, 8, 1>}, {transform_indices = @transform_2, window_bounds = array<i64: 1, 1, 32>}]} {
    %c0 = arith.constant 0 : index
    %c0_0 = arith.constant 0 : index
    %c0_1 = arith.constant 0 : index
    %0 = vector.load %arg3[%c0, %c0_0, %c0_1] : memref<1x8x32xf32, #tpu.memory_space<vmem>>, vector<1x8x32xf32>
    %c0_2 = arith.constant 0 : index
    %c0_3 = arith.constant 0 : index
    %c0_4 = arith.constant 0 : index
    %1 = vector.load %arg4[%c0_2, %c0_3, %c0_4] : memref<1x8x1xf32, #tpu.memory_space<vmem>>, vector<1x8x1xf32>
    %cst = arith.constant 0.000000e+00 : f32
    %2 = vector.broadcast %cst : f32 to vector<1x8x1xf32>
    %3 = arith.cmpf oeq, %1, %2 : vector<1x8x1xf32>
    %cst_5 = arith.constant -1.000000e+04 : f32
    %4 = vector.broadcast %cst_5 : f32 to vector<1x8x32xf32>
    %5 = vector.shape_cast %3 : vector<1x8x1xi1> to vector<1x8x1xi1>
    %6 = vector.broadcast %5 : vector<1x8x1xi1> to vector<1x8x32xi1>
    %7 = arith.select %6, %4, %0 : vector<1x8x32xi1>, vector<1x8x32xf32>
    %cst_6 = arith.constant dense<0xFF800000> : vector<1x32xf32>
    %8 = vector.multi_reduction <maximumf>, %7, %cst_6 [1] : vector<1x8x32xf32> to vector<1x32xf32>
    %9 = vector.shape_cast %8 : vector<1x32xf32> to vector<1x1x32xf32>
    %c0_i32 = arith.constant 0 : i32
    %10 = arith.cmpi eq, %arg2, %c0_i32 : i32
    %11 = arith.extui %10 : i1 to i32
    %c0_i32_7 = arith.constant 0 : i32
    %12 = arith.cmpi ne, %11, %c0_i32_7 : i32
    scf.if %12 {
      %c0_10 = arith.constant 0 : index
      %c0_11 = arith.constant 0 : index
      %c0_12 = arith.constant 0 : index
      %16 = vector.load %arg5[%c0_10, %c0_11, %c0_12] : memref<1x1x32xf32, #tpu.memory_space<vmem>>, vector<1x1x32xf32>
      tpu.vector_store %arg5[%c0_10, %c0_11, %c0_12], %9 {strides = array<i32>} : memref<1x1x32xf32, #tpu.memory_space<vmem>>, vector<1x1x32xf32>,
    } else {
    }
    %c0_i32_8 = arith.constant 0 : i32
    %13 = arith.cmpi sgt, %arg2, %c0_i32_8 : i32
    %14 = arith.extui %13 : i1 to i32
    %c0_i32_9 = arith.constant 0 : i32
    %15 = arith.cmpi ne, %14, %c0_i32_9 : i32
    scf.if %15 {
      %c0_10 = arith.constant 0 : index
      %c0_11 = arith.constant 0 : index
      %c0_12 = arith.constant 0 : index
      %16 = vector.load %arg5[%c0_10, %c0_11, %c0_12] : memref<1x1x32xf32, #tpu.memory_space<vmem>>, vector<1x1x32xf32>
      %17 = arith.maximumf %16, %9 : vector<1x1x32xf32>
      %c0_13 = arith.constant 0 : index
      %c0_14 = arith.constant 0 : index
      %c0_15 = arith.constant 0 : index
      %18 = vector.load %arg5[%c0_13, %c0_14, %c0_15] : memref<1x1x32xf32, #tpu.memory_space<vmem>>, vector<1x1x32xf32>
      tpu.vector_store %arg5[%c0_13, %c0_14, %c0_15], %17 {strides = array<i32>} : memref<1x1x32xf32, #tpu.memory_space<vmem>>, vector<1x1x32xf32>,
    } else {
    }
    return
  }
  func.func @transform_0(%arg0: i32, %arg1: i32, %arg2: i32) -> (i32, i32, i32) {
    %c0_i32 = arith.constant 0 : i32
    return %arg0, %arg2, %arg1 : i32, i32, i32
  }
  func.func @transform_1(%arg0: i32, %arg1: i32, %arg2: i32) -> (i32, i32, i32) {
    %c0_i32 = arith.constant 0 : i32
    %c0_i32_0 = arith.constant 0 : i32
    return %arg0, %arg2, %c0_i32 : i32, i32, i32
  }
  func.func @transform_2(%arg0: i32, %arg1: i32, %arg2: i32) -> (i32, i32, i32) {
    %c0_i32 = arith.constant 0 : i32
    %c0_i32_0 = arith.constant 0 : i32
    return %arg0, %c0_i32, %arg1 : i32, i32, i32
  }
}

</mosaic_0001>

<bundles_post_ra>
// kernel: tpu_custom_call.1
= control target key start
LH: loop header
LB: loop body
LE: loop exit
PB: predicated region body
PF: predicated region fallthrough
CT: control target
= control target key end

     0   :  { %7 = vsyncpa [#allocation3], 0  ;;  %s621_s0 = inlined_call_operand.vmem [shape: f32[2,8,32], index: 0, kind: input, shape index: {}]   ;;  %s622_s1 = inlined_call_operand.vmem [shape: f32[2,8,1], index: 1, kind: input, shape index: {}]   ;;  %s623_s2 = inlined_call_operand.hbm [shape: f32[2,1,32], index: 2, kind: output, shape index: {}]  }
   0x1   :  { %9 = vsyncpa [#allocation3 + $0x1], 0  ;;  %s506_s9 = smov 0   ;;  %s508_s10 = smov 0  }
   0x2   :  { %s510_s11 = smov 0   ;;  %s512_s12 = smov 0  }
   0x3   :  { %s514_s13 = smov 0   ;;  %s516_s14 = smov 0  }
   0x4 LB: > { %s342_s15 = sadd.s32 4294967295, %s487_s14   ;;  %s343_s16 = sadd.s32 4294967294, %s487_s14   ;;  %s487_s14 = sphi %s516_s14, %s15_s14   ;;  %s483_s13 = sphi %s514_s13, %s630_s13   ;;  %s479_s12 = sphi %s512_s12, %s629_s12   ;;  %s475_s11 = sphi %s510_s11, %s628_s11   ;;  %s471_s10 = sphi %s508_s10, %s627_s10   ;;  %s467_s9 = sphi %s506_s9, %s626_s9  }
   0x5   : > { %s34_s17 = sadd.s32 1, %s483_s13  ;;  %s101_s18 = sadd.s32 1, %s475_s11 }
   0x6   : > { %p36_p0 = scmp.ge.s32.totalorder %s34_s17, 2  ;;  %p111_p1 = scmp.ne.s32.totalorder %s475_s11, %s471_s10 }
   0x7   : > { %p112_p2 = scmp.eq.s32.totalorder %s342_s15, 1  ;;  %p117_p3 = scmp.ne.s32.totalorder %s471_s10, %s467_s9 }
   0x8   : > { %s632_s17 = smov (%p36_p0, %s34_s17), 0  ;;  %p118_p5 = scmp.eq.s32.totalorder %s343_s16, 1 }
   0x9   : > { %p546_p4 = por %p112_p2, %p111_p1  ;;  %s96_s20 = ssub.s32 %s483_s13, %s632_s17 }
   0xa   : > { %p346_p6 = scmp.ge.s32.totalorder %s487_s14, 1  ;;  %p99_p7 = scmp.eq.s32.totalorder %s96_s20, 0 }
   0xb   : > { %p553_p8 = por %p118_p5, %p117_p3  ;;  %p159_p9 = scmp.lt.s32.totalorder %s487_s14, 3 }
   0xc   : > { %s559_s22 = scalar_select %p99_p7, %s475_s11, %s101_s18  }
   0xd   : > { %p160_p10 = pnand %p346_p6, %p159_p9 }
   0xe   : > { %p192_p11 = scmp.lt.s32.totalorder (!%p160_p10), %s479_s12, 1  ;;  %v489_v0 = vmov (!%p160_p10), 0   ;;  %vm218_vm1 = vcmask (!%p160_p10), 261120   ;;  %s190_s3 = sand.u32 (!%p160_p10), 1, %s471_s10   ;;  %vm230_vm3 = vcmask (!%p160_p10), 253952  }
   0xf   : > { %163 = sbr.rel (%p160_p10) target bundleno = 186 (0xba), region = 28  ;;  %408 = vset.pattern.permute.xlu0 (!%p160_p10), %v489_v0  ;;  %s349_s4 = sshll.u32 (!%p160_p10), %s479_s12, 4 }
  0x10   : > { %s191_s5 = scalar_lea.vmem (!%p160_p10), [#allocation2], %s190_s3  ;;  %s574_s15 = scalar_lea.hbm (!%p160_p10), %s623_s2, %s349_s4 }
  0x11   : > { %s254_s6 = sshll.u32 (!%p160_p10), %s191_s5, 4  ;;  %s241_s16 = scalar_lea.sflag (!%p160_p10), [#allocation3], %s190_s3  ;;  %s576_s6 = int_to_ptr.vmem [resolvable:$true] %s254_s6 }
  0x12   : > { %s409_s18 = scalar_lea.vmem (!%p160_p10), %s576_s6, 16 }
  0x13   : > { %p410_p12 = scmp.ne.s32.totalorder (!%p160_p10), %s576_s6, %s409_s18 }
  0x15   : > { %p411_p13 = pnand (!%p160_p10), %p410_p12, %p546_p4 }
  0x16   : > { %s193_s23 = scalar_select %p192_p11, %s479_s12, 1 }
  0x17   : > { %p412_p0 = pneg %p411_p13  ;;  %s490_s12 = smov [#allocation2]  }
  0x18   : > { %s347_s24 = sshll.u32 %s193_s23, 3  ;;  %s413_s20 = sshll.u32 %s490_s12, 4  ;;  %s414_s20 = int_to_ptr.vmem [resolvable:$false] %s413_s20 }
  0x19   : > { %s208_s27 = scalar_lea.vmem %s622_s1, %s347_s24  ;;  %s201_s30 = scalar_lea.vmem %s621_s0, %s347_s24 }
  0x1a   : > { %v210_v1 = vld [vmem:[%s208_s27] sm:$0xff]  ;;  %s415_s23 = scalar_lea.vmem %s414_s20, 32  ;;  %p416_p1 = scmp.lt.s32.totalorder %s576_s6, %s414_s20 }
  0x1b   : > { %vm211_vm0 = vcmp.eq.f32.partialorder %v210_v1, 0.0  ;;  %v209_v3 = vld [vmem:[%s201_s30] sm:$0xff]  ;;  %p417_p2 = scmp.lt.s32.totalorder %s415_s23, %s409_s18 }
  0x1c   : > { %v212_v2 = vsel %vm211_vm0, 1, %v489_v0 }
  0x1d   : > { %214 = vperm.xlu0 %408, %v212_v2   ;;  %p418_p3 = por %p417_p2, %p416_p1 }
  0x1f   : > { %p419_p5 = pnand %p418_p3, %p412_p0 }
  0x9c   : > { %v215_v4 = vpop.permute.xlu0 %214 }
  0x9d   : > { %vm216_vm2 = vcmp.eq.s32.totalorder %v215_v4, 1 }
  0x9e   : > { %v217_v5 = vsel %vm216_vm2, -10000.0, %v209_v3 }
  0x9f   : > { %v219_v6 = vsel %vm218_vm1, %v217_v5, -inf }
  0xa0   : > { %v220_v7 = vrot.slane %v219_v6, 4 }
  0xa2   : > { %v221_v8 = vmax.f32 %v219_v6, %v220_v7 }
  0xa4   : > { %v222_v9 = vrot.slane %v221_v8, 2 }
  0xa6   : > { %v223_v10 = vmax.f32 %v221_v8, %v222_v9 }
  0xa8   : > { %v224_v11 = vrot.slane %v223_v10, 1 }
  0xaa   : > { %v225_v12 = vmax.f32 %v223_v10, %v224_v11 }
  0xac   : > { %231 = vst.msk [vmem:[%s191_s5] sm:$0x1] %vm230_vm3, %v225_v12 }
  0xad   : > { %422 = shalt.err (!%p419_p5)
}
  0xae   : > { %s423_s24 = scalar_lea.hbm %s574_s15, 16  ;;  %s427_s27 = scalar_lea.hbm %s623_s2, 32 }
  0xaf   : > { %p424_p6 = scmp.ne.s32.totalorder %s574_s15, %s423_s24  ;;  %p428_p10 = scmp.lt.u32.totalorder %s574_s15, %s623_s2 }
  0xb0   : > { %p429_p11 = scmp.lt.u32.totalorder %s427_s27, %s423_s24  ;;  %p431_p13 = scmp.lt.u32.totalorder %s423_s24, %s574_s15 }
  0xb1   : > { %p425_p7 = pnand %p424_p6, %p546_p4 }
  0xb2   : > { %p430_p12 = por %p429_p11, %p428_p10 }
  0xb3   : > { %p426_p9 = pneg %p425_p7 }
  0xb4   : > { %p432_p0 = por %p431_p13, %p430_p12 }
  0xb6   : > { %p433_p1 = pnand %p432_p0, %p426_p9 }
  0xb8   : > { %436 = shalt.err (!%p433_p1)
}
  0xb9   : > { %352 = dma.vmem_to_hbm [thread:$0]  (%p546_p4), %s576_s6, 16, %s574_s15, %s241_s16  }
  0xba PF: > { %p358_p2 = scmp.ge.s32.totalorder %s487_s14, 2  ;;  %s266_s30 = sand.u32 1, %s467_s9  }
  0xbb   : > { %s267_s3 = scalar_lea.sflag [#allocation3], %s266_s30 }
  0xbc   : > { %p355_p3 = pnand %p358_p2, %p553_p8 }
  0xbe   : > { %462 = dma.done.wait (!%p355_p3), %s267_s3, 16  }
  0xbf   : > { %464 = vsyncadd (!%p355_p3), %s267_s3, 4294967280  ;;  %s15_s14 = sadd.s32 1, %s487_s14   ;;  %s626_s9 = smov %s471_s10 }
  0xc0   : > { %p12_p5 = scmp.ge.s32.totalorder %s15_s14, 4   ;;  %s627_s10 = smov %s475_s11 }
  0xc1   : > { %s628_s11 = smov %s559_s22  ;;  %s629_s12 = smov %s483_s13 }
  0xc2   : > { %s630_s13 = smov %s632_s17  ;;  %14 = sbr.rel (!%p12_p5) target bundleno = 4 (0x4), region = 74 }
  0xc9   :  { %271 = vsyncpa [#allocation3], 1 }
  0xca   :  { %273 = vsyncpa [#allocation3 + $0x1], 1 }

</bundles_post_ra>
